<compile_context>
chip_gen: v6e
topology: v6e:2x2x1
jax: 0.10.0
libtpu: 0.0.40
codegen_flags: <defaults>
</compile_context>

<pallas_src>
import jax
import jax.numpy as jnp
from jax.experimental import pallas as pl
from jax.experimental.pallas import tpu as pltpu

TASK_NUM = 2  # matches MultiTaskLossWrapper(task_num=2); forward only uses tasks 0 and 1


def multitask_loss_kernel(losses_ref, log_vars_ref, out_ref):
    # losses_ref:   (TASK_NUM,) f32 in SMEM
    # log_vars_ref: (TASK_NUM,) f32 in SMEM
    # out_ref:      (1, 1)      f32 in VMEM
    l0 = losses_ref[0]
    l1 = losses_ref[1]
    lv0 = log_vars_ref[0]
    lv1 = log_vars_ref[1]

    # Splat SMEM scalars into lane-0 (1,1) values: exp runs on the EUP (vector
    # transcendental unit — the scalar unit has no transcendentals) and all
    # arithmetic stays lane-local, so there is no dependence on padding lanes
    # and no XLU cross-lane reduction.
    l0v = jnp.full((1, 1), l0, dtype=jnp.float32)
    l1v = jnp.full((1, 1), l1, dtype=jnp.float32)
    lv0v = jnp.full((1, 1), lv0, dtype=jnp.float32)
    lv1v = jnp.full((1, 1), lv1, dtype=jnp.float32)

    w0 = jnp.exp(-lv0v) * l0v + lv0v   # precision0 * loss0 + log_var0
    w1 = jnp.exp(-lv1v) * l1v + lv1v   # precision1 * loss1 + log_var1
    out_ref[...] = w0 + w1


def multitask_loss(losses, log_vars):
    """losses: (TASK_NUM,) f32, log_vars: (TASK_NUM,) f32  ->  (1, 1) f32.

    Returns the (1, 1) result tile; the consumer indexes/fuses it (avoids an
    extra post-call slice op in this wrapper, per perf review).
    """
    # dtype checks are trace-time only; no runtime op is emitted if already f32.
    if losses.dtype != jnp.float32:
        losses = losses.astype(jnp.float32)
    if log_vars.dtype != jnp.float32:
        log_vars = log_vars.astype(jnp.float32)

    out = pl.pallas_call(
        multitask_loss_kernel,
        out_shape=jax.ShapeDtypeStruct((1, 1), jnp.float32),
        in_specs=[
            pl.BlockSpec(memory_space=pltpu.MemorySpace.SMEM),
            pl.BlockSpec(memory_space=pltpu.MemorySpace.SMEM),
        ],
        out_specs=pl.BlockSpec(memory_space=pltpu.MemorySpace.VMEM),
        cost_estimate=pl.CostEstimate(flops=6, transcendentals=2, bytes_accessed=20),
    )(losses, log_vars)
    return out


if __name__ == "__main__":
    key = jax.random.PRNGKey(0)

    # Deterministic parameter init, matching nn.Parameter(torch.zeros(task_num)).
    log_vars = jnp.zeros((TASK_NUM,), dtype=jnp.float32)

    # Example per-task losses (stand-ins for the two task losses fed to forward()).
    losses = jax.random.uniform(key, (TASK_NUM,), dtype=jnp.float32, minval=0.1, maxval=2.0)

    result = multitask_loss(losses, log_vars)
    result = jax.block_until_ready(result)

    # Pure-JAX reference for correctness.
    ref = (jnp.exp(-log_vars[0]) * losses[0] + log_vars[0]
           + jnp.exp(-log_vars[1]) * losses[1] + log_vars[1])
    assert jnp.allclose(result[0, 0], ref, rtol=1e-6, atol=1e-6), (result, ref)

    print("KERNEL_OK")
</pallas_src>

<mosaic_0001>
module attributes {stable_mosaic.version = 11 : i64} {
  func.func @multitask_loss_kernel(%arg0: memref<2xf32, #tpu.memory_space<smem>>, %arg1: memref<2xf32, #tpu.memory_space<smem>>, %arg2: memref<1x1xf32, #tpu.memory_space<vmem>>) attributes {dimension_semantics = [], scalar_prefetch = 0 : i64, scratch_operands = 0 : i64, tpu.core_type = #tpu.core_type<tc>} {
    %c0 = arith.constant 0 : index
    %0 = memref.load %arg0[%c0] : memref<2xf32, #tpu.memory_space<smem>>
    %c1 = arith.constant 1 : index
    %1 = memref.load %arg0[%c1] : memref<2xf32, #tpu.memory_space<smem>>
    %c0_0 = arith.constant 0 : index
    %2 = memref.load %arg1[%c0_0] : memref<2xf32, #tpu.memory_space<smem>>
    %c1_1 = arith.constant 1 : index
    %3 = memref.load %arg1[%c1_1] : memref<2xf32, #tpu.memory_space<smem>>
    %4 = vector.broadcast %0 : f32 to vector<1x1xf32>
    %5 = vector.broadcast %1 : f32 to vector<1x1xf32>
    %6 = vector.broadcast %2 : f32 to vector<1x1xf32>
    %7 = vector.broadcast %3 : f32 to vector<1x1xf32>
    %cst = arith.constant 0.000000e+00 : f32
    %8 = vector.broadcast %cst : f32 to vector<1x1xf32>
    %9 = arith.subf %8, %6 : vector<1x1xf32>
    %10 = math.exp %9 : vector<1x1xf32>
    %11 = arith.mulf %10, %4 : vector<1x1xf32>
    %12 = arith.addf %11, %6 : vector<1x1xf32>
    %cst_2 = arith.constant 0.000000e+00 : f32
    %13 = vector.broadcast %cst_2 : f32 to vector<1x1xf32>
    %14 = arith.subf %13, %7 : vector<1x1xf32>
    %15 = math.exp %14 : vector<1x1xf32>
    %16 = arith.mulf %15, %5 : vector<1x1xf32>
    %17 = arith.addf %16, %7 : vector<1x1xf32>
    %18 = arith.addf %12, %17 : vector<1x1xf32>
    %c0_3 = arith.constant 0 : index
    %c0_4 = arith.constant 0 : index
    %19 = vector.load %arg2[%c0_3, %c0_4] : memref<1x1xf32, #tpu.memory_space<vmem>>, vector<1x1xf32>
    tpu.vector_store %arg2[%c0_3, %c0_4], %18 {strides = array<i32>} : memref<1x1xf32, #tpu.memory_space<vmem>>, vector<1x1xf32>,
    return
  }
}

</mosaic_0001>

<bundles_post_ra>
// kernel: tpu_custom_call.1
= control target key start
LH: loop header
LB: loop body
LE: loop exit
PB: predicated region body
PF: predicated region fallthrough
CT: control target
= control target key end

     0   :  { %7 = vsyncpa [#allocation4], 0  ;;  %s154_s0 = inlined_call_operand.hbm [shape: f32[2], index: 0, kind: input, shape index: {}]   ;;  %s155_s1 = inlined_call_operand.vmem [shape: f32[2], index: 1, kind: input, shape index: {}]   ;;  %s156_s2 = inlined_call_operand.hbm [shape: f32[1,1], index: 2, kind: output, shape index: {}]  }
   0x1   :  { %8 = vsyncpa [#allocation5], 0 }
   0x2   :  { %9 = vsyncpa [#allocation3], 0  ;;  %s24_s11 = sshll.u32 %s155_s1, 4  ;;  %s127_s12 = smov [#allocation2]   ;;  %s25_s11 = int_to_ptr.vmem [resolvable:$true] %s24_s11 }
   0x3   :  { %17 = dma.hbm_to_smem %s154_s0, 16, %s127_s12, [#allocation4]  }
   0x4   :  { %s89_s15 = scalar_lea.vmem %s25_s11, 16  ;;  %p94_p1 = scmp.lt.s32.totalorder %s25_s11, %s25_s11 }
   0x5   :  { %p90_p0 = scmp.ne.s32.totalorder %s25_s11, %s89_s15  ;;  %p95_p2 = scmp.lt.s32.totalorder %s89_s15, %s89_s15 }
   0x7   :  { %p96_p3 = por %p95_p2, %p94_p1 }
   0x9   :  { %p97_p4 = pnand %p96_p3, %p90_p0 }
   0xb   :  { %100 = shalt.err (!%p97_p4)
}
   0xc   :  { %s128_s16 = smov [#allocation6]  }
   0xd   :  { %27 = dma.vmem_to_smem %s25_s11, 16, %s128_s16, [#allocation5]  }
   0xe   :  { %121 = dma.done.wait [#allocation4], 16  }
   0xf   :  { %122 = vsyncadd [#allocation4], 4294967280 }
  0x10   :  { %123 = dma.done.wait [#allocation5], 16  }
  0x11   :  { %124 = vsyncadd [#allocation5], 4294967280 }
  0x12   :  { %34 = sfence }
  0x13   :  { %s37_s1 = sld [smem:[#allocation6]]  ;;  %s129_s19 = smov [#allocation7]   ;;  %vm54_vm0 = vcmask 0  }
  0x14   :  { %s73_s17 = sld [smem:[#allocation6 + $0x1]]  ;;  %s62_s20 = sshll.u32 %s129_s19, 4  ;;  %s63_s20 = int_to_ptr.vmem [resolvable:$true] %s62_s20 }
  0x15   :  { %s35_s0 = sld [smem:[#allocation2]]  ;;  %s101_s21 = scalar_lea.vmem %s63_s20, 16 }
  0x16   :  { %s72_s18 = sld [smem:[#allocation2 + $0x1]]  ;;  %p102_p5 = scmp.ne.s32.totalorder %s63_s20, %s101_s21 }
  0x17   :  { %s105_s22 = scalar_lea.vmem %s63_s20, 32  ;;  %p106_p6 = scmp.lt.s32.totalorder %s63_s20, %s63_s20 }
  0x18   :  { %p107_p7 = scmp.lt.s32.totalorder %s105_s22, %s101_s21 }
  0x19   :  { %v41_v0 = vstv %s37_s1 }
  0x1a   :  { %v42_v1 = vstv %s73_s17  ;;  %v43_v2 = vsub.f32 0.0, %v41_v0  ;;  %p108_p8 = por %p107_p7, %p106_p6 }
  0x1b   :  { %v48_v3 = vsub.f32 0.0, %v42_v1  ;;  %v39_v6 = vstv %s35_s0 }
  0x1c   :  { %v44_v4 = vmul.f32 1.442695, %v43_v2  ;;  %v40_v7 = vstv %s72_s18  ;;  %p109_p9 = pnand %p108_p8, %p102_p5 }
  0x1d   :  { %v49_v5 = vmul.f32 1.442695, %v48_v3 }
  0x1e   :  { %77 = vpow2.f32 %v44_v4 }
  0x1f   :  { %79 = vpow2.f32 %v49_v5 }
  0x2b   :  { %v78_v8 = vpop.eup %77 }
  0x2c   :  { %v80_v9 = vpop.eup %79  ;;  %v46_v10 = vmul.f32 %v78_v8, %v39_v6 }
  0x2d   :  { %v51_v11 = vmul.f32 %v80_v9, %v40_v7 }
  0x2e   :  { %v47_v12 = vadd.f32 %v46_v10, %v41_v0 }
  0x2f   :  { %v52_v13 = vadd.f32 %v51_v11, %v42_v1 }
  0x31   :  { %v53_v14 = vadd.f32 %v52_v13, %v47_v12 }
  0x33   :  { %55 = vst.msk [vmem:[#allocation7] sm:$0x1] %vm54_vm0, %v53_v14 }
  0x34   :  { %112 = shalt.err (!%p109_p9)
}
  0x35   :  { %65 = dma.vmem_to_hbm [thread:$0]  %s63_s20, 16, %s156_s2, [#allocation3]  }
  0x36   :  { %125 = dma.done.wait [#allocation3], 16  }
  0x37   :  { %126 = vsyncadd [#allocation3], 4294967280 }
  0x38   :  { %69 = vsyncpa [#allocation3], 1 }
  0x39   :  { %70 = vsyncpa [#allocation4], 1 }
  0x3a   :  { %71 = vsyncpa [#allocation5], 1 }

</bundles_post_ra>
